<compile_context>
chip_gen: v5e
topology: v5e:2x2
jax: 0.10.0
libtpu: 0.0.40
codegen_flags: <defaults>
</compile_context>

<pallas_src>
import functools

import jax
import jax.numpy as jnp
from jax.experimental import pallas as pl
from jax.experimental.pallas import tpu as pltpu

LANE = 128  # TPU lane width; all layer output widths are padded to this.


def _round_up(n, m):
    return pl.cdiv(n, m) * m


def make_mlp_kernel(num_layers, compute_dtype):
    """Build a fused MLP kernel body for `num_layers` Linear layers."""

    def kernel(x_ref, *refs):
        o_ref = refs[-1]
        h = x_ref[...].astype(compute_dtype)
        for li in range(num_layers):
            w_ref = refs[2 * li]
            b_ref = refs[2 * li + 1]
            # MXU matmul with f32 accumulation; bias add / ReLU on the VPU.
            y = jnp.dot(h, w_ref[...], preferred_element_type=jnp.float32)
            y = y + b_ref[...]                    # (1, out_pad) broadcasts
            if li < num_layers - 1:
                y = jnp.maximum(y, 0.0)
                h = y.astype(compute_dtype)       # back to MXU input dtype
            else:
                h = y                             # final layer: no activation
        o_ref[...] = h.astype(o_ref.dtype)

    return kernel


def prepare_params(params, compute_dtype=jnp.float32, lane=LANE):
    """Zero-pad every layer's output width to a multiple of `lane` and cast
    weights to `compute_dtype` (biases stay f32 for the f32 accumulate path).

    params: list of (w, b) with w shape (in, out) == PyTorch weight.T,
            b shape (1, out).
    Padded lanes carry exactly zero through the whole network (zero bias,
    ReLU(0)=0, zero weight rows in the next layer), so results are unchanged.
    """
    prepared = []
    prev_out_pad = params[0][0].shape[0]          # d_in stays unpadded
    for w, b in params:
        fin, fout = w.shape
        fin_p = prev_out_pad
        fout_p = _round_up(fout, lane)
        w_p = jnp.zeros((fin_p, fout_p), compute_dtype)
        w_p = w_p.at[:fin, :fout].set(w.astype(compute_dtype))
        b_p = jnp.zeros((1, fout_p), jnp.float32)
        b_p = b_p.at[:, :fout].set(b.astype(jnp.float32))
        prepared.append((w_p, b_p))
        prev_out_pad = fout_p
    return prepared


def neural_network_forward(x, prepared_params, d_out, *, block_batch=128,
                           compute_dtype=None):
    """Run the fused MLP. `prepared_params` comes from prepare_params()."""
    if compute_dtype is None:
        compute_dtype = prepared_params[0][0].dtype

    batch, d_in = x.shape
    out_pad = prepared_params[-1][0].shape[1]
    num_layers = len(prepared_params)

    # Batch tile: whole batch if small, otherwise block_batch rows per step.
    tile = block_batch if batch > block_batch else batch
    padded_batch = _round_up(batch, tile)

    x_in = x.astype(compute_dtype)
    if padded_batch != batch:
        x_in = jnp.pad(x_in, ((0, padded_batch - batch), (0, 0)))

    flat = []
    for w, b in prepared_params:
        flat.extend([w, b])

    grid = (padded_batch // tile,)

    in_specs = [pl.BlockSpec((tile, d_in), lambda i: (i, 0))]
    # Weights/biases: full-array blocks with a constant index_map -> they are
    # DMA'd once and stay resident in VMEM across all grid steps.
    for arr in flat:
        in_specs.append(pl.BlockSpec(arr.shape, lambda i: (0, 0)))
    out_specs = pl.BlockSpec((tile, out_pad), lambda i: (i, 0))

    out_padded = pl.pallas_call(
        make_mlp_kernel(num_layers, compute_dtype),
        out_shape=jax.ShapeDtypeStruct((padded_batch, out_pad), jnp.float32),
        grid=grid,
        in_specs=in_specs,
        out_specs=out_specs,
        compiler_params=pltpu.CompilerParams(
            dimension_semantics=("parallel",)),
    )(x_in, *flat)

    return out_padded[:batch, :d_out]


def init_params(key, dims):
    """Deterministic PyTorch-Linear-style init; dims = [d_in, h1..h5, d_out].
    Weights stored as (in, out) == PyTorch weight.T, biases as (1, out)."""
    params = []
    for i in range(len(dims) - 1):
        fan_in, fan_out = dims[i], dims[i + 1]
        key, kw, kb = jax.random.split(key, 3)
        bound = 1.0 / jnp.sqrt(fan_in)
        w = jax.random.uniform(kw, (fan_in, fan_out), jnp.float32, -bound, bound)
        b = jax.random.uniform(kb, (1, fan_out), jnp.float32, -bound, bound)
        params.append((w, b))
    return params


def reference_forward(x, params):
    h = x
    n = len(params)
    for i, (w, b) in enumerate(params):
        h = h @ w + b
        if i < n - 1:
            h = jnp.maximum(h, 0.0)
    return h


if __name__ == "__main__":
    key = jax.random.PRNGKey(0)
    # NeuralNetwork(d_in, hid_1, hid_2, hid_3, hid_4, hid_5, d_out)
    dims = [32, 64, 48, 64, 48, 32, 16]
    d_in, d_out = dims[0], dims[-1]

    key, kp = jax.random.split(key)
    params = init_params(kp, dims)
    ref_fn = jax.jit(functools.partial(reference_forward, params=params))

    # --- f32 path, small batch (single grid step) ---------------------------
    prep_f32 = prepare_params(params, jnp.float32)
    key, kx = jax.random.split(key)
    x_small = jax.random.normal(kx, (8, d_in), jnp.float32)
    out_small = jax.block_until_ready(
        neural_network_forward(x_small, prep_f32, d_out))
    ref_small = ref_fn(x_small)
    assert out_small.shape == (8, d_out)
    assert jnp.allclose(out_small, ref_small, atol=1e-4, rtol=1e-4)

    # --- f32 path, larger batch: 4 grid steps, parallel over cores ----------
    key, kx = jax.random.split(key)
    x_big = jax.random.normal(kx, (512, d_in), jnp.float32)
    out_big = jax.block_until_ready(
        neural_network_forward(x_big, prep_f32, d_out, block_batch=128))
    ref_big = ref_fn(x_big)
    assert out_big.shape == (512, d_out)
    assert jnp.allclose(out_big, ref_big, atol=1e-4, rtol=1e-4)

    # --- f32 path, ragged batch (exercises batch zero-padding) --------------
    key, kx = jax.random.split(key)
    x_rag = jax.random.normal(kx, (200, d_in), jnp.float32)
    out_rag = jax.block_until_ready(
        neural_network_forward(x_rag, prep_f32, d_out, block_batch=128))
    ref_rag = ref_fn(x_rag)
    assert out_rag.shape == (200, d_out)
    assert jnp.allclose(out_rag, ref_rag, atol=1e-4, rtol=1e-4)

    # --- bf16 weights/activations, f32 accumulation (v6e/v7x MXU path) ------
    prep_bf16 = prepare_params(params, jnp.bfloat16)
    out_bf16 = jax.block_until_ready(
        neural_network_forward(x_big.astype(jnp.bfloat16), prep_bf16, d_out,
                               block_batch=128, compute_dtype=jnp.bfloat16))
    assert out_bf16.shape == (512, d_out)
    assert jnp.allclose(out_bf16, ref_big, atol=5e-2, rtol=5e-2)

    print("KERNEL_OK")
</pallas_src>

<mosaic_0001>
module attributes {stable_mosaic.version = 11 : i64} {
  func.func @kernel(%arg0: i32, %arg1: memref<8x32xf32, #tpu.memory_space<vmem>>, %arg2: memref<32x128xf32, #tpu.memory_space<vmem>>, %arg3: memref<1x128xf32, #tpu.memory_space<vmem>>, %arg4: memref<128x128xf32, #tpu.memory_space<vmem>>, %arg5: memref<1x128xf32, #tpu.memory_space<vmem>>, %arg6: memref<128x128xf32, #tpu.memory_space<vmem>>, %arg7: memref<1x128xf32, #tpu.memory_space<vmem>>, %arg8: memref<128x128xf32, #tpu.memory_space<vmem>>, %arg9: memref<1x128xf32, #tpu.memory_space<vmem>>, %arg10: memref<128x128xf32, #tpu.memory_space<vmem>>, %arg11: memref<1x128xf32, #tpu.memory_space<vmem>>, %arg12: memref<128x128xf32, #tpu.memory_space<vmem>>, %arg13: memref<1x128xf32, #tpu.memory_space<vmem>>, %arg14: memref<8x128xf32, #tpu.memory_space<vmem>>) attributes {dimension_semantics = [#tpu.dimension_semantics<parallel>], iteration_bounds = array<i64: 1>, scalar_prefetch = 0 : i64, scratch_operands = 0 : i64, tpu.core_type = #tpu.core_type<tc>, window_params = [{transform_indices = @transform_0, window_bounds = array<i64: 8, 32>}, {pipeline_mode = #tpu.pipeline_mode<synchronous>, transform_indices = @transform_1, window_bounds = array<i64: 32, 128>}, {pipeline_mode = #tpu.pipeline_mode<synchronous>, transform_indices = @transform_2, window_bounds = array<i64: 1, 128>}, {pipeline_mode = #tpu.pipeline_mode<synchronous>, transform_indices = @transform_3, window_bounds = array<i64: 128, 128>}, {pipeline_mode = #tpu.pipeline_mode<synchronous>, transform_indices = @transform_4, window_bounds = array<i64: 1, 128>}, {pipeline_mode = #tpu.pipeline_mode<synchronous>, transform_indices = @transform_5, window_bounds = array<i64: 128, 128>}, {pipeline_mode = #tpu.pipeline_mode<synchronous>, transform_indices = @transform_6, window_bounds = array<i64: 1, 128>}, {pipeline_mode = #tpu.pipeline_mode<synchronous>, transform_indices = @transform_7, window_bounds = array<i64: 128, 128>}, {pipeline_mode = #tpu.pipeline_mode<synchronous>, transform_indices = @transform_8, window_bounds = array<i64: 1, 128>}, {pipeline_mode = #tpu.pipeline_mode<synchronous>, transform_indices = @transform_9, window_bounds = array<i64: 128, 128>}, {pipeline_mode = #tpu.pipeline_mode<synchronous>, transform_indices = @transform_10, window_bounds = array<i64: 1, 128>}, {pipeline_mode = #tpu.pipeline_mode<synchronous>, transform_indices = @transform_11, window_bounds = array<i64: 128, 128>}, {pipeline_mode = #tpu.pipeline_mode<synchronous>, transform_indices = @transform_12, window_bounds = array<i64: 1, 128>}, {transform_indices = @transform_13, window_bounds = array<i64: 8, 128>}]} {
    %c0 = arith.constant 0 : index
    %c0_0 = arith.constant 0 : index
    %0 = vector.load %arg1[%c0, %c0_0] : memref<8x32xf32, #tpu.memory_space<vmem>>, vector<8x32xf32>
    %c0_1 = arith.constant 0 : index
    %c0_2 = arith.constant 0 : index
    %1 = vector.load %arg2[%c0_1, %c0_2] : memref<32x128xf32, #tpu.memory_space<vmem>>, vector<32x128xf32>
    %cst = arith.constant dense<0.000000e+00> : vector<8x128xf32>
    %2 = tpu.matmul %0, %1, %cst {dimension_numbers = #tpu.dot_dimension_numbers<[1], [0], [0], [1], [0, 0, 1, 1], [], []>} : vector<8x32xf32>, vector<32x128xf32>, vector<8x128xf32> -> vector<8x128xf32>
    %c0_3 = arith.constant 0 : index
    %c0_4 = arith.constant 0 : index
    %3 = vector.load %arg3[%c0_3, %c0_4] : memref<1x128xf32, #tpu.memory_space<vmem>>, vector<1x128xf32>
    %4 = vector.broadcast %3 : vector<1x128xf32> to vector<8x128xf32>
    %5 = arith.addf %2, %4 : vector<8x128xf32>
    %cst_5 = arith.constant 0.000000e+00 : f32
    %6 = vector.broadcast %cst_5 : f32 to vector<8x128xf32>
    %7 = arith.maximumf %5, %6 : vector<8x128xf32>
    %c0_6 = arith.constant 0 : index
    %c0_7 = arith.constant 0 : index
    %8 = vector.load %arg4[%c0_6, %c0_7] : memref<128x128xf32, #tpu.memory_space<vmem>>, vector<128x128xf32>
    %cst_8 = arith.constant dense<0.000000e+00> : vector<8x128xf32>
    %9 = tpu.matmul %7, %8, %cst_8 {dimension_numbers = #tpu.dot_dimension_numbers<[1], [0], [0], [1], [0, 0, 1, 1], [], []>} : vector<8x128xf32>, vector<128x128xf32>, vector<8x128xf32> -> vector<8x128xf32>
    %c0_9 = arith.constant 0 : index
    %c0_10 = arith.constant 0 : index
    %10 = vector.load %arg5[%c0_9, %c0_10] : memref<1x128xf32, #tpu.memory_space<vmem>>, vector<1x128xf32>
    %11 = vector.broadcast %10 : vector<1x128xf32> to vector<8x128xf32>
    %12 = arith.addf %9, %11 : vector<8x128xf32>
    %cst_11 = arith.constant 0.000000e+00 : f32
    %13 = vector.broadcast %cst_11 : f32 to vector<8x128xf32>
    %14 = arith.maximumf %12, %13 : vector<8x128xf32>
    %c0_12 = arith.constant 0 : index
    %c0_13 = arith.constant 0 : index
    %15 = vector.load %arg6[%c0_12, %c0_13] : memref<128x128xf32, #tpu.memory_space<vmem>>, vector<128x128xf32>
    %cst_14 = arith.constant dense<0.000000e+00> : vector<8x128xf32>
    %16 = tpu.matmul %14, %15, %cst_14 {dimension_numbers = #tpu.dot_dimension_numbers<[1], [0], [0], [1], [0, 0, 1, 1], [], []>} : vector<8x128xf32>, vector<128x128xf32>, vector<8x128xf32> -> vector<8x128xf32>
    %c0_15 = arith.constant 0 : index
    %c0_16 = arith.constant 0 : index
    %17 = vector.load %arg7[%c0_15, %c0_16] : memref<1x128xf32, #tpu.memory_space<vmem>>, vector<1x128xf32>
    %18 = vector.broadcast %17 : vector<1x128xf32> to vector<8x128xf32>
    %19 = arith.addf %16, %18 : vector<8x128xf32>
    %cst_17 = arith.constant 0.000000e+00 : f32
    %20 = vector.broadcast %cst_17 : f32 to vector<8x128xf32>
    %21 = arith.maximumf %19, %20 : vector<8x128xf32>
    %c0_18 = arith.constant 0 : index
    %c0_19 = arith.constant 0 : index
    %22 = vector.load %arg8[%c0_18, %c0_19] : memref<128x128xf32, #tpu.memory_space<vmem>>, vector<128x128xf32>
    %cst_20 = arith.constant dense<0.000000e+00> : vector<8x128xf32>
    %23 = tpu.matmul %21, %22, %cst_20 {dimension_numbers = #tpu.dot_dimension_numbers<[1], [0], [0], [1], [0, 0, 1, 1], [], []>} : vector<8x128xf32>, vector<128x128xf32>, vector<8x128xf32> -> vector<8x128xf32>
    %c0_21 = arith.constant 0 : index
    %c0_22 = arith.constant 0 : index
    %24 = vector.load %arg9[%c0_21, %c0_22] : memref<1x128xf32, #tpu.memory_space<vmem>>, vector<1x128xf32>
    %25 = vector.broadcast %24 : vector<1x128xf32> to vector<8x128xf32>
    %26 = arith.addf %23, %25 : vector<8x128xf32>
    %cst_23 = arith.constant 0.000000e+00 : f32
    %27 = vector.broadcast %cst_23 : f32 to vector<8x128xf32>
    %28 = arith.maximumf %26, %27 : vector<8x128xf32>
    %c0_24 = arith.constant 0 : index
    %c0_25 = arith.constant 0 : index
    %29 = vector.load %arg10[%c0_24, %c0_25] : memref<128x128xf32, #tpu.memory_space<vmem>>, vector<128x128xf32>
    %cst_26 = arith.constant dense<0.000000e+00> : vector<8x128xf32>
    %30 = tpu.matmul %28, %29, %cst_26 {dimension_numbers = #tpu.dot_dimension_numbers<[1], [0], [0], [1], [0, 0, 1, 1], [], []>} : vector<8x128xf32>, vector<128x128xf32>, vector<8x128xf32> -> vector<8x128xf32>
    %c0_27 = arith.constant 0 : index
    %c0_28 = arith.constant 0 : index
    %31 = vector.load %arg11[%c0_27, %c0_28] : memref<1x128xf32, #tpu.memory_space<vmem>>, vector<1x128xf32>
    %32 = vector.broadcast %31 : vector<1x128xf32> to vector<8x128xf32>
    %33 = arith.addf %30, %32 : vector<8x128xf32>
    %cst_29 = arith.constant 0.000000e+00 : f32
    %34 = vector.broadcast %cst_29 : f32 to vector<8x128xf32>
    %35 = arith.maximumf %33, %34 : vector<8x128xf32>
    %c0_30 = arith.constant 0 : index
    %c0_31 = arith.constant 0 : index
    %36 = vector.load %arg12[%c0_30, %c0_31] : memref<128x128xf32, #tpu.memory_space<vmem>>, vector<128x128xf32>
    %cst_32 = arith.constant dense<0.000000e+00> : vector<8x128xf32>
    %37 = tpu.matmul %35, %36, %cst_32 {dimension_numbers = #tpu.dot_dimension_numbers<[1], [0], [0], [1], [0, 0, 1, 1], [], []>} : vector<8x128xf32>, vector<128x128xf32>, vector<8x128xf32> -> vector<8x128xf32>
    %c0_33 = arith.constant 0 : index
    %c0_34 = arith.constant 0 : index
    %38 = vector.load %arg13[%c0_33, %c0_34] : memref<1x128xf32, #tpu.memory_space<vmem>>, vector<1x128xf32>
    %39 = vector.broadcast %38 : vector<1x128xf32> to vector<8x128xf32>
    %40 = arith.addf %37, %39 : vector<8x128xf32>
    %c0_35 = arith.constant 0 : index
    %c0_36 = arith.constant 0 : index
    %41 = vector.load %arg14[%c0_35, %c0_36] : memref<8x128xf32, #tpu.memory_space<vmem>>, vector<8x128xf32>
    tpu.vector_store %arg14[%c0_35, %c0_36], %40 {strides = array<i32>} : memref<8x128xf32, #tpu.memory_space<vmem>>, vector<8x128xf32>,
    return
  }
  func.func @transform_0(%arg0: i32) -> (i32, i32) {
    %c0_i32 = arith.constant 0 : i32
    %c0_i32_0 = arith.constant 0 : i32
    return %arg0, %c0_i32 : i32, i32
  }
  func.func @transform_1(%arg0: i32) -> (i32, i32) {
    %c0_i32 = arith.constant 0 : i32
    %c0_i32_0 = arith.constant 0 : i32
    %c0_i32_1 = arith.constant 0 : i32
    return %c0_i32, %c0_i32_0 : i32, i32
  }
  func.func @transform_2(%arg0: i32) -> (i32, i32) {
    %c0_i32 = arith.constant 0 : i32
    %c0_i32_0 = arith.constant 0 : i32
    %c0_i32_1 = arith.constant 0 : i32
    return %c0_i32, %c0_i32_0 : i32, i32
  }
  func.func @transform_3(%arg0: i32) -> (i32, i32) {
    %c0_i32 = arith.constant 0 : i32
    %c0_i32_0 = arith.constant 0 : i32
    %c0_i32_1 = arith.constant 0 : i32
    return %c0_i32, %c0_i32_0 : i32, i32
  }
  func.func @transform_4(%arg0: i32) -> (i32, i32) {
    %c0_i32 = arith.constant 0 : i32
    %c0_i32_0 = arith.constant 0 : i32
    %c0_i32_1 = arith.constant 0 : i32
    return %c0_i32, %c0_i32_0 : i32, i32
  }
  func.func @transform_5(%arg0: i32) -> (i32, i32) {
    %c0_i32 = arith.constant 0 : i32
    %c0_i32_0 = arith.constant 0 : i32
    %c0_i32_1 = arith.constant 0 : i32
    return %c0_i32, %c0_i32_0 : i32, i32
  }
  func.func @transform_6(%arg0: i32) -> (i32, i32) {
    %c0_i32 = arith.constant 0 : i32
    %c0_i32_0 = arith.constant 0 : i32
    %c0_i32_1 = arith.constant 0 : i32
    return %c0_i32, %c0_i32_0 : i32, i32
  }
  func.func @transform_7(%arg0: i32) -> (i32, i32) {
    %c0_i32 = arith.constant 0 : i32
    %c0_i32_0 = arith.constant 0 : i32
    %c0_i32_1 = arith.constant 0 : i32
    return %c0_i32, %c0_i32_0 : i32, i32
  }
  func.func @transform_8(%arg0: i32) -> (i32, i32) {
    %c0_i32 = arith.constant 0 : i32
    %c0_i32_0 = arith.constant 0 : i32
    %c0_i32_1 = arith.constant 0 : i32
    return %c0_i32, %c0_i32_0 : i32, i32
  }
  func.func @transform_9(%arg0: i32) -> (i32, i32) {
    %c0_i32 = arith.constant 0 : i32
    %c0_i32_0 = arith.constant 0 : i32
    %c0_i32_1 = arith.constant 0 : i32
    return %c0_i32, %c0_i32_0 : i32, i32
  }
  func.func @transform_10(%arg0: i32) -> (i32, i32) {
    %c0_i32 = arith.constant 0 : i32
    %c0_i32_0 = arith.constant 0 : i32
    %c0_i32_1 = arith.constant 0 : i32
    return %c0_i32, %c0_i32_0 : i32, i32
  }
  func.func @transform_11(%arg0: i32) -> (i32, i32) {
    %c0_i32 = arith.constant 0 : i32
    %c0_i32_0 = arith.constant 0 : i32
    %c0_i32_1 = arith.constant 0 : i32
    return %c0_i32, %c0_i32_0 : i32, i32
  }
  func.func @transform_12(%arg0: i32) -> (i32, i32) {
    %c0_i32 = arith.constant 0 : i32
    %c0_i32_0 = arith.constant 0 : i32
    %c0_i32_1 = arith.constant 0 : i32
    return %c0_i32, %c0_i32_0 : i32, i32
  }
  func.func @transform_13(%arg0: i32) -> (i32, i32) {
    %c0_i32 = arith.constant 0 : i32
    %c0_i32_0 = arith.constant 0 : i32
    return %arg0, %c0_i32 : i32, i32
  }
}

</mosaic_0001>

<bundles_post_ra>
// kernel: tpu_custom_call.1
= control target key start
LH: loop header
LB: loop body
LE: loop exit
PB: predicated region body
PF: predicated region fallthrough
CT: control target
= control target key end

     0   :  { %18 = vsyncpa [#allocation3], 0  ;;  %s770_s0 = inlined_call_operand.hbm [shape: f32[8,32], index: 0, kind: input, shape index: {}]   ;;  %s771_s1 = inlined_call_operand.hbm [shape: f32[32,128], index: 1, kind: input, shape index: {}]   ;;  %s772_s2 = inlined_call_operand.vmem [shape: f32[1,128], index: 2, kind: input, shape index: {}]   ;;  %s773_s3 = inlined_call_operand.hbm [shape: f32[128,128], index: 3, kind: input, shape index: {}]   ;;  %s774_s4 = inlined_call_operand.vmem [shape: f32[1,128], index: 4, kind: input, shape index: {}]   ;;  %s775_s5 = inlined_call_operand.hbm [shape: f32[128,128], index: 5, kind: input, shape index: {}]   ;;  %s776_s6 = inlined_call_operand.vmem [shape: f32[1,128], index: 6, kind: input, shape index: {}]   ;;  %s777_s7 = inlined_call_operand.hbm [shape: f32[128,128], index: 7, kind: input, shape index: {}]   ;;  %s778_s8 = inlined_call_operand.vmem [shape: f32[1,128], index: 8, kind: input, shape index: {}]   ;;  %s779_s9 = inlined_call_operand.hbm [shape: f32[128,128], index: 9, kind: input, shape index: {}]   ;;  %s780_s10 = inlined_call_operand.vmem [shape: f32[1,128], index: 10, kind: input, shape index: {}]   ;;  %s781_s11 = inlined_call_operand.hbm [shape: f32[128,128], index: 11, kind: input, shape index: {}]   ;;  %s782_s12 = inlined_call_operand.vmem [shape: f32[1,128], index: 12, kind: input, shape index: {}]   ;;  %s783_s13 = inlined_call_operand.hbm [shape: f32[8,128], index: 13, kind: output, shape index: {}]  }
   0x1   :  { %19 = vsyncpa [#allocation6], 0 }
   0x2   :  { %20 = vsyncpa [#allocation9], 0 }
   0x3   :  { %21 = vsyncpa [#allocation12], 0  ;;  %s38_s27 = sshll.u32 %s771_s1, 4  ;;  %s39_s27 = int_to_ptr.hbm [resolvable:$true] %s38_s27 }
   0x4   :  { %22 = vsyncpa [#allocation4], 0  ;;  %s630_s28 = smov [#allocation5]   ;;  %s68_s15 = sshll.u32 %s775_s5, 4  ;;  %s69_s15 = int_to_ptr.hbm [resolvable:$true] %s68_s15 }
   0x5   :  { %s40_s29 = sshll.u32 %s630_s28, 4  ;;  %s631_s16 = smov 128   ;;  %s41_s29 = int_to_ptr.vmem [resolvable:$true] %s40_s29 }
   0x6   :  { %s632_s17 = smov 8   ;;  %s633_s18 = smov [#allocation8]  }
   0x7   :  { %46 = dma.hbm_to_vmem [thread:$0]  %s39_s27, 512, %s41_s29, [#allocation6], %s631_s16, %s631_s16, %s632_s17  }
   0x8   :  { %s70_s19 = sshll.u32 %s633_s18, 4  ;;  %s98_s21 = sshll.u32 %s779_s9, 4  ;;  %s71_s19 = int_to_ptr.vmem [resolvable:$true] %s70_s19  ;;  %s99_s21 = int_to_ptr.hbm [resolvable:$true] %s98_s21 }
   0x9   :  { %76 = dma.hbm_to_vmem [thread:$0]  %s69_s15, 2048, %s71_s19, [#allocation9], %s631_s16, %s631_s16, %s632_s17  }
   0xa   :  { %s28_s23 = sshll.u32 %s770_s0, 4  ;;  %s634_s24 = smov [#allocation11]   ;;  %s29_s23 = int_to_ptr.hbm [resolvable:$true] %s28_s23 }
   0xb   :  { %s100_s25 = sshll.u32 %s634_s24, 4  ;;  %s635_s26 = smov [#allocation2]   ;;  %s101_s25 = int_to_ptr.vmem [resolvable:$true] %s100_s25 }
   0xc   :  { %106 = dma.hbm_to_vmem [thread:$0]  %s99_s21, 2048, %s101_s25, [#allocation12], %s631_s16, %s631_s16, %s632_s17  }
   0xd   :  { %s30_s9 = sshll.u32 %s635_s26, 4  ;;  %s53_s29 = sshll.u32 %s773_s3, 4  ;;  %s31_s9 = int_to_ptr.vmem [resolvable:$true] %s30_s9  ;;  %s54_s29 = int_to_ptr.hbm [resolvable:$true] %s53_s29 }
   0xe   :  { %33 = dma.hbm_to_vmem [thread:$0]  %s29_s23, 128, %s31_s9, [#allocation3]  }
   0xf   :  { %s83_s0 = sshll.u32 %s777_s7, 4  ;;  %s636_s15 = smov [#allocation7]   ;;  %s84_s0 = int_to_ptr.hbm [resolvable:$true] %s83_s0 }
  0x10   :  { %s55_s18 = sshll.u32 %s636_s15, 4  ;;  %s637_s19 = smov [#allocation10]   ;;  %s56_s18 = int_to_ptr.vmem [resolvable:$true] %s55_s18 }
  0x11   :  { %61 = dma.hbm_to_vmem [thread:$0]  %s54_s29, 2048, %s56_s18, [#allocation6], %s631_s16, %s631_s16, %s632_s17  }
  0x12   :  { %s85_s20 = sshll.u32 %s637_s19, 4  ;;  %s113_s3 = sshll.u32 %s781_s11, 4  ;;  %s86_s20 = int_to_ptr.vmem [resolvable:$true] %s85_s20  ;;  %s114_s3 = int_to_ptr.hbm [resolvable:$true] %s113_s3 }
  0x13   :  { %91 = dma.hbm_to_vmem [thread:$0]  %s84_s0, 2048, %s86_s20, [#allocation9], %s631_s16, %s631_s16, %s632_s17  }
  0x14   :  { %s638_s7 = smov [#allocation13]  }
  0x15   :  { %s115_s5 = sshll.u32 %s638_s7, 4  ;;  %s116_s5 = int_to_ptr.vmem [resolvable:$true] %s115_s5 }
  0x16   :  { %121 = dma.hbm_to_vmem [thread:$0]  %s114_s3, 2048, %s116_s5, [#allocation12], %s631_s16, %s631_s16, %s632_s17  }
  0x17   :  { %620 = dma.done.wait [#allocation3], 128  }
  0x18   :  { %621 = vsyncadd [#allocation3], 4294967168 }
  0x19   :  { %622 = dma.done.wait [#allocation6], 2560  }
  0x1a   :  { %623 = vsyncadd [#allocation6], 4294964736 }
  0x1b   :  { %624 = dma.done.wait [#allocation9], 4096  }
  0x1c   :  { %625 = vsyncadd [#allocation9], 4294963200 }
  0x1d   :  { %626 = dma.done.wait [#allocation12], 4096  }
  0x1e   :  { %627 = vsyncadd [#allocation12], 4294963200  ;;  %v156_v0 = vld [vmem:[#allocation5 + $0x18] sm:$0xff]  ;;  %v155_v1 = vld [vmem:[#allocation5 + $0x10] sm:$0xff]  ;;  %vm161_vm0 = vcmask 261120   ;;  %s639_s9 = smov [#allocation14]  }
  0x1f   :  { %177 = vmatpush.msra.mxu0 %v156_v0  ;;  %v201_v2 = vld [vmem:[#allocation7 + $0x78] sm:$0xff]  ;;  %v154_v3 = vld [vmem:[#allocation5 + $0x8] sm:$0xff]  ;;  %v200_v4 = vld [vmem:[#allocation7 + $0x70] sm:$0xff]  ;;  %s396_s27 = sshll.u32 %s639_s9, 4  ;;  %s398_s30 = sshll.u32 %s783_s13, 4  ;;  %s397_s27 = int_to_ptr.vmem [resolvable:$true] %s396_s27  ;;  %s399_s30 = int_to_ptr.hbm [resolvable:$true] %s398_s30 }
  0x20   :  { %206 = vmatpush.msra.mxu1 %v201_v2  ;;  %v199_v5 = vld [vmem:[#allocation7 + $0x68] sm:$0xff]  ;;  %v153_v6 = vld [vmem:[#allocation5] sm:$0xff]  ;;  %v152_v7 = vld [vmem:[#allocation2] sm:$0xff] }
  0x21   :  { %178 = vmatpush.msra.mxu0 %v155_v1  ;;  %v198_v8 = vld [vmem:[#allocation7 + $0x60] sm:$0xff]  ;;  %v197_v9 = vld [vmem:[#allocation7 + $0x58] sm:$0xff]  ;;  %v196_v10 = vld [vmem:[#allocation7 + $0x50] sm:$0xff] }
  0x22   :  { %207 = vmatpush.msra.mxu1 %v200_v4  ;;  %v195_v11 = vld [vmem:[#allocation7 + $0x48] sm:$0xff]  ;;  %v194_v12 = vld [vmem:[#allocation7 + $0x40] sm:$0xff]  ;;  %v193_v13 = vld [vmem:[#allocation7 + $0x38] sm:$0xff] }
  0x23   :  { %179 = vmatpush.msra.mxu0 %v154_v3  ;;  %v192_v14 = vld [vmem:[#allocation7 + $0x30] sm:$0xff]  ;;  %v191_v15 = vld [vmem:[#allocation7 + $0x28] sm:$0xff]  ;;  %v190_v16 = vld [vmem:[#allocation7 + $0x20] sm:$0xff] }
  0x24   :  { %208 = vmatpush.msra.mxu1 %v199_v5  ;;  %v189_v17 = vld [vmem:[#allocation7 + $0x18] sm:$0xff]  ;;  %v188_v18 = vld [vmem:[#allocation7 + $0x10] sm:$0xff]  ;;  %v187_v19 = vld [vmem:[#allocation7 + $0x8] sm:$0xff] }
  0x25   :  { %180 = vmatpush.msra.mxu0 %v153_v6  ;;  %v186_v20 = vld [vmem:[#allocation7] sm:$0xff]  ;;  %v242_v21 = vld [vmem:[#allocation8 + $0x78] sm:$0xff]  ;;  %v241_v22 = vld [vmem:[#allocation8 + $0x70] sm:$0xff] }
  0x26   :  { %411 = vmatmul.msk.f32.vlgmr.msra.gmra.mxu0 %vm161_vm0, %v152_v7  ;;  %209 = vmatpush.msra.mxu1 %v198_v8  ;;  %v240_v23 = vld [vmem:[#allocation8 + $0x68] sm:$0xff]  ;;  %v239_v24 = vld [vmem:[#allocation8 + $0x60] sm:$0xff]  ;;  %v238_v25 = vld [vmem:[#allocation8 + $0x58] sm:$0xff] }
  0x27   :  { %247 = vmatpush.msra.mxu2 %v242_v21  ;;  %v237_v26 = vld [vmem:[#allocation8 + $0x50] sm:$0xff]  ;;  %v236_v27 = vld [vmem:[#allocation8 + $0x48] sm:$0xff]  ;;  %v235_v28 = vld [vmem:[#allocation8 + $0x40] sm:$0xff] }
  0x28   :  { %210 = vmatpush.msra.mxu1 %v197_v9  ;;  %v234_v29 = vld [vmem:[#allocation8 + $0x38] sm:$0xff]  ;;  %v233_v30 = vld [vmem:[#allocation8 + $0x30] sm:$0xff]  ;;  %v232_v31 = vld [vmem:[#allocation8 + $0x28] sm:$0xff] }
  0x29   :  { %248 = vmatpush.msra.mxu2 %v241_v22  ;;  %v231_v32 = vld [vmem:[#allocation8 + $0x20] sm:$0xff]  ;;  %v230_v33 = vld [vmem:[#allocation8 + $0x18] sm:$0xff]  ;;  %v229_v38 = vld [vmem:[#allocation8 + $0x10] sm:$0xff] }
  0x2a   :  { %211 = vmatpush.msra.mxu1 %v196_v10  ;;  %v422_v34 = vld [vmem:[%s772_s2] ss:$0 sm:$0xff]  ;;  %v228_v39 = vld [vmem:[#allocation8 + $0x8] sm:$0xff]  ;;  %v227_v40 = vld [vmem:[#allocation8] sm:$0xff] }
  0x2b   :  { %249 = vmatpush.msra.mxu2 %v240_v23  ;;  %v283_v41 = vld [vmem:[#allocation10 + $0x78] sm:$0xff]  ;;  %v282_v42 = vld [vmem:[#allocation10 + $0x70] sm:$0xff]  ;;  %v281_v43 = vld [vmem:[#allocation10 + $0x68] sm:$0xff] }
  0x2c   :  { %212 = vmatpush.msra.mxu1 %v195_v11  ;;  %288 = vmatpush.msra.mxu3 %v283_v41  ;;  %v280_v44 = vld [vmem:[#allocation10 + $0x60] sm:$0xff]  ;;  %v279_v45 = vld [vmem:[#allocation10 + $0x58] sm:$0xff]  ;;  %v278_v46 = vld [vmem:[#allocation10 + $0x50] sm:$0xff] }
  0x2d   :  { %250 = vmatpush.msra.mxu2 %v239_v24  ;;  %v277_v47 = vld [vmem:[#allocation10 + $0x48] sm:$0xff]  ;;  %v276_v48 = vld [vmem:[#allocation10 + $0x40] sm:$0xff]  ;;  %v275_v49 = vld [vmem:[#allocation10 + $0x38] sm:$0xff] }
  0x2e   :  { %213 = vmatpush.msra.mxu1 %v194_v12  ;;  %289 = vmatpush.msra.mxu3 %v282_v42  ;;  %v274_v50 = vld [vmem:[#allocation10 + $0x30] sm:$0xff]  ;;  %v273_v51 = vld [vmem:[#allocation10 + $0x28] sm:$0xff]  ;;  %v272_v52 = vld [vmem:[#allocation10 + $0x20] sm:$0xff] }
  0x2f   :  { %251 = vmatpush.msra.mxu2 %v238_v25  ;;  %v271_v53 = vld [vmem:[#allocation10 + $0x18] sm:$0xff]  ;;  %v270_v58 = vld [vmem:[#allocation10 + $0x10] sm:$0xff]  ;;  %v269_v59 = vld [vmem:[#allocation10 + $0x8] sm:$0xff] }
  0x30   :  { %214 = vmatpush.msra.mxu1 %v193_v13  ;;  %290 = vmatpush.msra.mxu3 %v281_v43  ;;  %v423_v54 = vld [vmem:[%s774_s4] ss:$0 sm:$0xff]  ;;  %v268_v60 = vld [vmem:[#allocation10] sm:$0xff]  ;;  %v323_v62 = vld [vmem:[#allocation11 + $0x70] sm:$0xff] }
  0x31   :  { %252 = vmatpush.msra.mxu2 %v237_v26  ;;  %v324_v61 = vld [vmem:[#allocation11 + $0x78] sm:$0xff]  ;;  %v322_v63 = vld [vmem:[#allocation11 + $0x68] sm:$0xff]  ;;  %v321_v0 = vld [vmem:[#allocation11 + $0x60] sm:$0xff] }
  0x32   :  { %215 = vmatpush.msra.mxu1 %v192_v14  ;;  %291 = vmatpush.msra.mxu3 %v280_v44  ;;  %v320_v1 = vld [vmem:[#allocation11 + $0x58] sm:$0xff]  ;;  %v319_v2 = vld [vmem:[#allocation11 + $0x50] sm:$0xff]  ;;  %v318_v3 = vld [vmem:[#allocation11 + $0x48] sm:$0xff] }
  0x33   :  { %253 = vmatpush.msra.mxu2 %v236_v27  ;;  %329 = vmatpush.msrb.mxu0 %v324_v61  ;;  %v317_v4 = vld [vmem:[#allocation11 + $0x40] sm:$0xff]  ;;  %v316_v5 = vld [vmem:[#allocation11 + $0x38] sm:$0xff]  ;;  %v315_v6 = vld [vmem:[#allocation11 + $0x30] sm:$0xff] }
  0x34   :  { %216 = vmatpush.msra.mxu1 %v191_v15  ;;  %292 = vmatpush.msra.mxu3 %v279_v45  ;;  %v314_v7 = vld [vmem:[#allocation11 + $0x28] sm:$0xff]  ;;  %v313_v8 = vld [vmem:[#allocation11 + $0x20] sm:$0xff]  ;;  %v312_v9 = vld [vmem:[#allocation11 + $0x18] sm:$0xff] }
  0x35   :  { %254 = vmatpush.msra.mxu2 %v235_v28  ;;  %330 = vmatpush.msrb.mxu0 %v323_v62  ;;  %v424_v10 = vld [vmem:[%s776_s6] ss:$0 sm:$0xff]  ;;  %v311_v14 = vld [vmem:[#allocation11 + $0x10] sm:$0xff]  ;;  %v310_v15 = vld [vmem:[#allocation11 + $0x8] sm:$0xff] }
  0x36   :  { %217 = vmatpush.msra.mxu1 %v190_v16  ;;  %293 = vmatpush.msra.mxu3 %v278_v46  ;;  %v309_v16 = vld [vmem:[#allocation11] sm:$0xff]  ;;  %v361_v21 = vld [vmem:[#allocation13 + $0x58] sm:$0xff]  ;;  %v360_v22 = vld [vmem:[#allocation13 + $0x50] sm:$0xff] }
  0x37   :  { %255 = vmatpush.msra.mxu2 %v234_v29  ;;  %331 = vmatpush.msrb.mxu0 %v322_v63  ;;  %v359_v23 = vld [vmem:[#allocation13 + $0x48] sm:$0xff]  ;;  %v358_v24 = vld [vmem:[#allocation13 + $0x40] sm:$0xff]  ;;  %v357_v25 = vld [vmem:[#allocation13 + $0x38] sm:$0xff] }
  0x38   :  { %218 = vmatpush.msra.mxu1 %v189_v17  ;;  %294 = vmatpush.msra.mxu3 %v277_v47  ;;  %v365_v17 = vld [vmem:[#allocation13 + $0x78] sm:$0xff]  ;;  %v356_v26 = vld [vmem:[#allocation13 + $0x30] sm:$0xff]  ;;  %v355_v27 = vld [vmem:[#allocation13 + $0x28] sm:$0xff] }
  0x39   :  { %256 = vmatpush.msra.mxu2 %v233_v30  ;;  %332 = vmatpush.msrb.mxu0 %v321_v0  ;;  %v354_v28 = vld [vmem:[#allocation13 + $0x20] sm:$0xff]  ;;  %v353_v29 = vld [vmem:[#allocation13 + $0x18] sm:$0xff] }
  0x3a   :  { %219 = vmatpush.msra.mxu1 %v188_v18  ;;  %295 = vmatpush.msra.mxu3 %v276_v48  ;;  %v364_v18 = vld [vmem:[#allocation13 + $0x70] sm:$0xff]  ;;  %v425_v30 = vld [vmem:[%s778_s8] ss:$0 sm:$0xff] }
  0x3b   :  { %257 = vmatpush.msra.mxu2 %v232_v31  ;;  %333 = vmatpush.msrb.mxu0 %v320_v1  ;;  %v427_v41 = vld [vmem:[%s782_s12] ss:$0 sm:$0xff] }
  0x3c   :  { %220 = vmatpush.msra.mxu1 %v187_v19  ;;  %296 = vmatpush.msra.mxu3 %v275_v49  ;;  %v363_v19 = vld [vmem:[#allocation13 + $0x68] sm:$0xff] }
  0x3d   :  { %258 = vmatpush.msra.mxu2 %v231_v32  ;;  %334 = vmatpush.msrb.mxu0 %v319_v2 }
  0x3e   :  { %221 = vmatpush.msra.mxu1 %v186_v20  ;;  %297 = vmatpush.msra.mxu3 %v274_v50  ;;  %v362_v20 = vld [vmem:[#allocation13 + $0x60] sm:$0xff] }
  0x3f   :  { %259 = vmatpush.msra.mxu2 %v230_v33  ;;  %335 = vmatpush.msrb.mxu0 %v318_v3 }
  0x40   :  { %298 = vmatpush.msra.mxu3 %v273_v51  ;;  %370 = vmatpush.msrb.mxu1 %v365_v17 }
  0x41   :  { %260 = vmatpush.msra.mxu2 %v229_v38  ;;  %336 = vmatpush.msrb.mxu0 %v317_v4 }
  0x42   :  { %299 = vmatpush.msra.mxu3 %v272_v52  ;;  %371 = vmatpush.msrb.mxu1 %v364_v18 }
  0x43   :  { %261 = vmatpush.msra.mxu2 %v228_v39  ;;  %337 = vmatpush.msrb.mxu0 %v316_v5 }
  0x44   :  { %300 = vmatpush.msra.mxu3 %v271_v53  ;;  %372 = vmatpush.msrb.mxu1 %v363_v19 }
  0x45   :  { %262 = vmatpush.msra.mxu2 %v227_v40  ;;  %338 = vmatpush.msrb.mxu0 %v315_v6 }
  0x46   :  { %301 = vmatpush.msra.mxu3 %v270_v58  ;;  %373 = vmatpush.msrb.mxu1 %v362_v20 }
  0x47   :  { %339 = vmatpush.msrb.mxu0 %v314_v7 }
  0x48   :  { %302 = vmatpush.msra.mxu3 %v269_v59  ;;  %374 = vmatpush.msrb.mxu1 %v361_v21 }
  0x49   :  { %340 = vmatpush.msrb.mxu0 %v313_v8 }
  0x4a   :  { %303 = vmatpush.msra.mxu3 %v268_v60  ;;  %375 = vmatpush.msrb.mxu1 %v360_v22 }
  0x4b   :  { %341 = vmatpush.msrb.mxu0 %v312_v9 }
  0x4c   :  { %376 = vmatpush.msrb.mxu1 %v359_v23 }
  0x4d   :  { %342 = vmatpush.msrb.mxu0 %v311_v14 }
  0x4e   :  { %377 = vmatpush.msrb.mxu1 %v358_v24 }
  0x4f   :  { %343 = vmatpush.msrb.mxu0 %v310_v15 }
  0x50   :  { %378 = vmatpush.msrb.mxu1 %v357_v25 }
  0x51   :  { %344 = vmatpush.msrb.mxu0 %v309_v16 }
  0x52   :  { %379 = vmatpush.msrb.mxu1 %v356_v26 }
  0x54   :  { %380 = vmatpush.msrb.mxu1 %v355_v27 }
  0x56   :  { %381 = vmatpush.msrb.mxu1 %v354_v28 }
  0x58   :  { %382 = vmatpush.msrb.mxu1 %v353_v29 }
  0xa3   :  { %v182_v35 = vpop.f32.mrf.mxu0 }
  0xa4   :  { %v183_v36 = vadd.f32 %v422_v34, %v182_v35  ;;  %v352_v34 = vld [vmem:[#allocation13 + $0x10] sm:$0xff]  ;;  %v351_v35 = vld [vmem:[#allocation13 + $0x8] sm:$0xff] }
  0xa5   :  { %383 = vmatpush.msrb.mxu1 %v352_v34 }
  0xa6   :  { %v185_v37 = vmax.f32 %v183_v36, 0.0  ;;  %v350_v36 = vld [vmem:[#allocation13] sm:$0xff] }
  0xa7   :  { %384 = vmatpush.msrb.mxu1 %v351_v35 }
  0xa8   :  { %222 = vmatmul.f32.vlgmr.msra.gmra.mxu1 %v185_v37  ;;  %v426_v37 = vld [vmem:[%s780_s10] ss:$0 sm:$0xff] }
  0xa9   :  { %385 = vmatpush.msrb.mxu1 %v350_v36 }
 0x125   :  { %v223_v55 = vpop.f32.mrf.mxu1 }
 0x126   :  { %v224_v56 = vadd.f32 %v423_v54, %v223_v55 }
 0x128   :  { %v226_v57 = vmax.f32 %v224_v56, 0.0 }
 0x12a   :  { %263 = vmatmul.f32.vlgmr.msra.gmra.mxu2 %v226_v57 }
 0x1ad   :  { %v264_v11 = vpop.f32.mrf.mxu2 }
 0x1ae   :  { %v265_v12 = vadd.f32 %v424_v10, %v264_v11 }
 0x1b0   :  { %v267_v13 = vmax.f32 %v265_v12, 0.0 }
 0x1b2   :  { %304 = vmatmul.f32.vlgmr.msra.gmra.mxu3 %v267_v13 }
 0x235   :  { %v305_v31 = vpop.f32.mrf.mxu3 }
 0x236   :  { %v306_v32 = vadd.f32 %v425_v30, %v305_v31 }
 0x238   :  { %v308_v33 = vmax.f32 %v306_v32, 0.0 }
 0x23a   :  { %345 = vmatmul.f32.vlgmr.msrb.gmra.mxu0 %v308_v33 }
 0x2b7   :  { %v346_v38 = vpop.f32.mrf.mxu0 }
 0x2b8   :  { %v347_v39 = vadd.f32 %v426_v37, %v346_v38 }
 0x2ba   :  { %v349_v40 = vmax.f32 %v347_v39, 0.0 }
 0x2bc   :  { %386 = vmatmul.f32.vlgmr.msrb.gmra.mxu1 %v349_v40 }
 0x339   :  { %v387_v42 = vpop.f32.mrf.mxu1 }
 0x33a   :  { %v388_v43 = vadd.f32 %v427_v41, %v387_v42 }
 0x33c   :  { %390 = vst [vmem:[#allocation14] sm:$0xff] %v388_v43 }
 0x33d   :  { %401 = dma.vmem_to_hbm [thread:$0]  %s397_s27, 128, %s399_s30, [#allocation4]  }
 0x33e   :  { %628 = dma.done.wait [#allocation4], 128  }
 0x33f   :  { %629 = vsyncadd [#allocation4], 4294967168 }
 0x340   :  { %406 = vsyncpa [#allocation3], 1 }
 0x341   :  { %407 = vsyncpa [#allocation6], 1 }
 0x342   :  { %408 = vsyncpa [#allocation9], 1 }
 0x343   :  { %409 = vsyncpa [#allocation12], 1 }
 0x344   :  { %410 = vsyncpa [#allocation4], 1 }

</bundles_post_ra>
